<compile_context>
chip_gen: v7x
topology: tpu7x:2x2x1
jax: 0.10.0
libtpu: 0.0.40
codegen_flags: <defaults>
</compile_context>

<pallas_src>
import functools

import jax
import jax.numpy as jnp
from jax.experimental import pallas as pl
from jax.experimental.pallas import tpu as pltpu


# --------------------------------------------------------------------------
# Kernel
# --------------------------------------------------------------------------
def _critic_mlp_kernel(x_ref, w1_ref, b1_ref, w2t_ref, b2_ref, o_ref, acc_ref):
    """One (batch tile, hidden chunk) step of logits = relu(x@W1+b1)@w2 + b2."""
    h_idx = pl.program_id(1)

    @pl.when(h_idx == 0)
    def _():
        acc_ref[...] = jnp.zeros_like(acc_ref)

    # MXU: (tm, D) bf16 @ (D, th) bf16 -> (tm, th) f32.  The f32 -> bf16 cast of
    # the x tile happens here (in-register), so x streams from HBM only once.
    h = jnp.dot(x_ref[...].astype(jnp.bfloat16), w1_ref[...],
                preferred_element_type=jnp.float32)
    h = jnp.maximum(h + b1_ref[...], 0.0)                       # f32 epilogue (VPU)

    # Second projection has N=1: broadcast multiply + lane reduction on VPU/XLU
    # instead of burning an MXU matmul on a single result column.
    acc_ref[...] += jnp.sum(h * w2t_ref[...], axis=-1, keepdims=True)

    @pl.when(h_idx == pl.num_programs(1) - 1)
    def _():
        o_ref[...] = (acc_ref[...] + b2_ref[0]).astype(o_ref.dtype)


# --------------------------------------------------------------------------
# Tiling / VMEM-budget selection
# --------------------------------------------------------------------------
def _round_up(n, m):
    return ((n + m - 1) // m) * m


@functools.lru_cache(maxsize=1)
def _vmem_limit_bytes():
    """Per-generation scoped-VMEM budget (v5e/v6e: 128 MiB phys; v7x: 64 MiB/TC)."""
    mib = 1024 * 1024
    try:
        phys = int(pltpu.get_tpu_info().vmem_capacity_bytes)
    except Exception:
        phys = 64 * mib                      # assume the tightest case (v7x per-TC)
    if phys >= 96 * mib:                     # v5e / v6e (128 MiB physical)
        return 100 * mib
    # v7x: 64 MiB per TensorCore; leave headroom (W1 is duplicated into each
    # TC's VMEM because the batch axis is megacore-"parallel").
    return max(min(phys - 8 * mib, 56 * mib), 24 * mib)


def _choose_tiles(B, D, H, block_batch, block_hidden, budget):
    """Pick (batch tile tm, hidden chunk th) that fit the scoped VMEM budget."""
    # Hidden chunks must be lane-aligned (multiple of 128) AND divide H exactly
    # so ragged-overhang garbage never enters the accumulated reduction.
    th_cands = [H] + [H // k for k in (2, 4, 8, 16, 32, 64)
                      if H % k == 0 and (H // k) % 128 == 0]
    if block_hidden is not None:
        assert block_hidden in th_cands, (
            "block_hidden must divide H and be a multiple of 128")
        th_cands = [int(block_hidden)]

    # x stays f32 in VMEM (cast to bf16 happens in-register), so a multiple of
    # 8 sublanes is the right alignment (the bf16 (16,128) packing rule does
    # not apply to the x BlockSpec).
    tm_cap = max(8, min(int(block_batch), _round_up(B, 8)))
    tm_cands = []
    tm = tm_cap
    while True:
        tm_cands.append(tm)
        if tm <= 8:
            break
        tm = max(8, _round_up(tm // 2, 8))

    def vmem_need(tm_, th_):
        thp = max(th_, 128)
        return (2 * tm_ * D * 4          # f32 x tile, double-buffered
                + 2 * D * th_ * 2        # bf16 W1 chunk, double-buffered
                + 4 * 8 * thp * 4        # b1 + w2^T chunks (sublane-padded), x2 buffers
                + tm_ * thp * 4          # f32 hidden tile (live value)
                + 2 * tm_ * 128 * 4      # (tm,1) output block (lane-padded), x2 buffers
                + tm_ * 128 * 4)         # accumulator scratch

    for tm_ in tm_cands:
        for th_ in th_cands:
            if vmem_need(tm_, th_) <= budget:
                return tm_, th_
    # Nothing fits comfortably (gigantic D): fall back to the smallest tiles.
    # TODO(synk): add a K(=D)-tiling grid axis for pathologically large D.
    return tm_cands[-1], th_cands[-1]


# --------------------------------------------------------------------------
# Wrappers
# --------------------------------------------------------------------------
def prepare_critic_params(w1, b1, w2, b2):
    """One-time parameter prep -- do this once and cache it with the weights.

    Returns (W1 as bf16 for the MXU, b1 as f32 row, w2^T as f32 row, b2 as f32
    scalar array for SMEM).  Note: bf16 rounding of W1 (and of x inside the
    kernel) is an intentional ~1e-3 precision trade-off for the critic head.
    """
    D, H = w1.shape
    return (jnp.asarray(w1, jnp.float32).astype(jnp.bfloat16),
            jnp.asarray(b1, jnp.float32).reshape(1, H),
            jnp.asarray(w2, jnp.float32).reshape(1, H),     # (H, 1) -> (1, H)
            jnp.asarray(b2, jnp.float32).reshape(1))


@functools.partial(jax.jit, static_argnames=("tm", "th", "vmem_limit"))
def _critic_forward_impl(x, w1_lo, b1_f, w2t_f, b2_f, *, tm, th, vmem_limit):
    B, D = x.shape
    H = w1_lo.shape[1]
    n_bt = pl.cdiv(B, tm)
    n_ht = H // th                                      # th divides H by construction

    w1_bytes = D * H * 2 * (n_bt if n_ht > 1 else 1)    # resident unless H is chunked
    cost = pl.CostEstimate(
        flops=2 * B * D * H + 3 * B * H,
        transcendentals=0,
        bytes_accessed=B * D * 4 + w1_bytes + (2 * H + 1) * 4 + B * 4,
    )

    out = pl.pallas_call(
        _critic_mlp_kernel,
        out_shape=jax.ShapeDtypeStruct((B, 1), jnp.float32),
        grid=(n_bt, n_ht),
        in_specs=[
            pl.BlockSpec((tm, D), lambda i, h: (i, 0)),   # x: streamed f32, cast in-kernel
            pl.BlockSpec((D, th), lambda i, h: (0, h)),   # W1 chunk (bf16)
            pl.BlockSpec((1, th), lambda i, h: (0, h)),   # b1 chunk (f32)
            pl.BlockSpec((1, th), lambda i, h: (0, h)),   # w2^T chunk (f32)
            pl.BlockSpec(memory_space=pltpu.MemorySpace.SMEM),  # b2 scalar in SMEM
        ],
        out_specs=pl.BlockSpec((tm, 1), lambda i, h: (i, 0)),
        scratch_shapes=[pltpu.VMEM((tm, 1), jnp.float32)],
        compiler_params=pltpu.CompilerParams(
            dimension_semantics=("parallel", "arbitrary"),  # megacore on batch axis
            vmem_limit_bytes=int(vmem_limit),
        ),
        cost_estimate=cost,
    )(x, w1_lo, b1_f, w2t_f, b2_f)

    return out[:, 0]    # squeeze to the 1-D logits `Critic` requires


def critic_forward(x, params, *, block_batch=512, block_hidden=None):
    """Pallas-backed Critic.forward: x (B, D) -> 1-D logits (B,).

    `params` comes from `prepare_critic_params` (so the bf16 cast of W1 is paid
    once, not per call).  Tiles and the scoped-VMEM limit are re-derived per
    TPU generation; no batch padding is ever materialized (the last batch tile
    may overhang -- OOB rows are masked on write).
    """
    w1_lo, b1_f, w2t_f, b2_f = params
    B, D = x.shape
    H = w1_lo.shape[1]

    if x.dtype != jnp.float32:
        x = x.astype(jnp.float32)

    budget = _vmem_limit_bytes()
    tm, th = _choose_tiles(B, D, H, block_batch, block_hidden, budget)
    return _critic_forward_impl(x, w1_lo, b1_f, w2t_f, b2_f,
                                tm=tm, th=th, vmem_limit=budget)


# --------------------------------------------------------------------------
# Demo / correctness check
# --------------------------------------------------------------------------
if __name__ == "__main__":
    key = jax.random.PRNGKey(0)
    kx, k1, k2, k3, k4, kx2 = jax.random.split(key, 6)

    def reference(x, w1, b1, w2, b2):
        # Same bf16 operand rounding as the kernel; f32 math otherwise.
        xr = x.astype(jnp.bfloat16).astype(jnp.float32)
        w1r = w1.astype(jnp.bfloat16).astype(jnp.float32)
        h = jnp.maximum(
            jnp.dot(xr, w1r, precision=jax.lax.Precision.HIGHEST) + b1, 0.0)
        return jnp.sum(h * w2[:, 0][None, :], axis=-1) + b2[0]

    # ---- case 1: small batch, single tile, resident W1 ----------------------
    B, D, H = 8, 256, 128
    x = jax.random.normal(kx, (B, D), jnp.float32)
    w1 = jax.random.normal(k1, (D, H), jnp.float32) * 0.1
    b1 = jax.random.normal(k2, (H,), jnp.float32) * 0.1
    w2 = jax.random.normal(k3, (H, 1), jnp.float32) * 0.1
    b2 = jax.random.normal(k4, (1,), jnp.float32) * 0.1

    params = prepare_critic_params(w1, b1, w2, b2)
    logits = jax.block_until_ready(critic_forward(x, params))
    ref = reference(x, w1, b1, w2, b2)
    assert logits.shape == (B,)
    assert jnp.allclose(logits, ref, atol=2e-3, rtol=2e-3), float(
        jnp.max(jnp.abs(logits - ref)))

    # ---- case 2: ragged batch tiles + chunked-H accumulation ----------------
    B2, D2, H2 = 72, 128, 256
    x2 = jax.random.normal(kx2, (B2, D2), jnp.float32)
    w1b = jax.random.normal(k1, (D2, H2), jnp.float32) * 0.1
    b1b = jax.random.normal(k2, (H2,), jnp.float32) * 0.1
    w2b = jax.random.normal(k3, (H2, 1), jnp.float32) * 0.1
    b2b = jax.random.normal(k4, (1,), jnp.float32) * 0.1

    params2 = prepare_critic_params(w1b, b1b, w2b, b2b)
    logits2 = jax.block_until_ready(
        critic_forward(x2, params2, block_batch=32, block_hidden=128))
    ref2 = reference(x2, w1b, b1b, w2b, b2b)
    assert logits2.shape == (B2,)
    assert jnp.allclose(logits2, ref2, atol=2e-3, rtol=2e-3), float(
        jnp.max(jnp.abs(logits2 - ref2)))

    # TODO(synk): Critic.loss / Critic.distance are abstract (`pass`) in the
    # source module, so there is nothing to translate for them.
    print("KERNEL_OK")
</pallas_src>

<mosaic_0001>
module attributes {stable_mosaic.version = 11 : i64} {
  func.func @_critic_mlp_kernel(%arg0: i32, %arg1: i32, %arg2: memref<8x256xf32, #tpu.memory_space<vmem>>, %arg3: memref<256x128xbf16, #tpu.memory_space<vmem>>, %arg4: memref<1x128xf32, #tpu.memory_space<vmem>>, %arg5: memref<1x128xf32, #tpu.memory_space<vmem>>, %arg6: memref<1xf32, #tpu.memory_space<smem>>, %arg7: memref<8x1xf32, #tpu.memory_space<vmem>>, %arg8: memref<8x1xf32, #tpu.memory_space<vmem>>) attributes {dimension_semantics = [#tpu.dimension_semantics<parallel>, #tpu.dimension_semantics<arbitrary>], iteration_bounds = array<i64: 1, 1>, scalar_prefetch = 0 : i64, scratch_operands = 1 : i64, tpu.core_type = #tpu.core_type<tc>, window_params = [{transform_indices = @transform_0, window_bounds = array<i64: 8, 256>}, {transform_indices = @transform_1, window_bounds = array<i64: 256, 128>}, {transform_indices = @transform_2, window_bounds = array<i64: 1, 128>}, {transform_indices = @transform_3, window_bounds = array<i64: 1, 128>}, {transform_indices = @transform_4, window_bounds = array<i64: 1>}, {transform_indices = @transform_5, window_bounds = array<i64: 8, 1>}]} {
    %c0_i32 = arith.constant 0 : i32
    %0 = arith.cmpi eq, %arg1, %c0_i32 : i32
    %1 = arith.extui %0 : i1 to i32
    %c0_i32_0 = arith.constant 0 : i32
    %2 = arith.cmpi ne, %1, %c0_i32_0 : i32
    scf.if %2 {
      %cst_16 = arith.constant 0.000000e+00 : f32
      %23 = vector.broadcast %cst_16 : f32 to vector<8x1xf32>
      %c0_17 = arith.constant 0 : index
      %c0_18 = arith.constant 0 : index
      %24 = vector.load %arg8[%c0_17, %c0_18] : memref<8x1xf32, #tpu.memory_space<vmem>>, vector<8x1xf32>
      tpu.vector_store %arg8[%c0_17, %c0_18], %23 {strides = array<i32>} : memref<8x1xf32, #tpu.memory_space<vmem>>, vector<8x1xf32>,
    } else {
    }
    %c0 = arith.constant 0 : index
    %c0_1 = arith.constant 0 : index
    %3 = vector.load %arg2[%c0, %c0_1] : memref<8x256xf32, #tpu.memory_space<vmem>>, vector<8x256xf32>
    %4 = arith.truncf %3 : vector<8x256xf32> to vector<8x256xbf16>
    %c0_2 = arith.constant 0 : index
    %c0_3 = arith.constant 0 : index
    %5 = vector.load %arg3[%c0_2, %c0_3] : memref<256x128xbf16, #tpu.memory_space<vmem>>, vector<256x128xbf16>
    %cst = arith.constant dense<0.000000e+00> : vector<8x128xf32>
    %6 = tpu.matmul %4, %5, %cst {dimension_numbers = #tpu.dot_dimension_numbers<[1], [0], [0], [1], [0, 0, 1, 1], [], []>} : vector<8x256xbf16>, vector<256x128xbf16>, vector<8x128xf32> -> vector<8x128xf32>
    %c0_4 = arith.constant 0 : index
    %c0_5 = arith.constant 0 : index
    %7 = vector.load %arg4[%c0_4, %c0_5] : memref<1x128xf32, #tpu.memory_space<vmem>>, vector<1x128xf32>
    %8 = vector.broadcast %7 : vector<1x128xf32> to vector<8x128xf32>
    %9 = arith.addf %6, %8 : vector<8x128xf32>
    %cst_6 = arith.constant 0.000000e+00 : f32
    %10 = vector.broadcast %cst_6 : f32 to vector<8x128xf32>
    %11 = arith.maximumf %9, %10 : vector<8x128xf32>
    %c0_7 = arith.constant 0 : index
    %c0_8 = arith.constant 0 : index
    %12 = vector.load %arg8[%c0_7, %c0_8] : memref<8x1xf32, #tpu.memory_space<vmem>>, vector<8x1xf32>
    %c0_9 = arith.constant 0 : index
    %c0_10 = arith.constant 0 : index
    %13 = vector.load %arg5[%c0_9, %c0_10] : memref<1x128xf32, #tpu.memory_space<vmem>>, vector<1x128xf32>
    %14 = vector.broadcast %13 : vector<1x128xf32> to vector<8x128xf32>
    %15 = arith.mulf %11, %14 : vector<8x128xf32>
    %cst_11 = arith.constant dense<0.000000e+00> : vector<8xf32>
    %16 = vector.multi_reduction <add>, %15, %cst_11 [1] : vector<8x128xf32> to vector<8xf32>
    %17 = vector.shape_cast %16 : vector<8xf32> to vector<8x1xf32>
    %18 = arith.addf %12, %17 : vector<8x1xf32>
    %c0_12 = arith.constant 0 : index
    %c0_13 = arith.constant 0 : index
    %19 = vector.load %arg8[%c0_12, %c0_13] : memref<8x1xf32, #tpu.memory_space<vmem>>, vector<8x1xf32>
    tpu.vector_store %arg8[%c0_12, %c0_13], %18 {strides = array<i32>} : memref<8x1xf32, #tpu.memory_space<vmem>>, vector<8x1xf32>,
    %c0_i32_14 = arith.constant 0 : i32
    %20 = arith.cmpi eq, %arg1, %c0_i32_14 : i32
    %21 = arith.extui %20 : i1 to i32
    %c0_i32_15 = arith.constant 0 : i32
    %22 = arith.cmpi ne, %21, %c0_i32_15 : i32
    scf.if %22 {
      %c0_16 = arith.constant 0 : index
      %c0_17 = arith.constant 0 : index
      %23 = vector.load %arg8[%c0_16, %c0_17] : memref<8x1xf32, #tpu.memory_space<vmem>>, vector<8x1xf32>
      %c0_18 = arith.constant 0 : index
      %24 = memref.load %arg6[%c0_18] : memref<1xf32, #tpu.memory_space<smem>>
      %25 = vector.broadcast %24 : f32 to vector<8x1xf32>
      %26 = arith.addf %23, %25 : vector<8x1xf32>
      %c0_19 = arith.constant 0 : index
      %c0_20 = arith.constant 0 : index
      %27 = vector.load %arg7[%c0_19, %c0_20] : memref<8x1xf32, #tpu.memory_space<vmem>>, vector<8x1xf32>
      tpu.vector_store %arg7[%c0_19, %c0_20], %26 {strides = array<i32>} : memref<8x1xf32, #tpu.memory_space<vmem>>, vector<8x1xf32>,
    } else {
    }
    return
  }
  func.func @transform_0(%arg0: i32, %arg1: i32) -> (i32, i32) {
    %c0_i32 = arith.constant 0 : i32
    %c0_i32_0 = arith.constant 0 : i32
    return %arg0, %c0_i32 : i32, i32
  }
  func.func @transform_1(%arg0: i32, %arg1: i32) -> (i32, i32) {
    %c0_i32 = arith.constant 0 : i32
    %c0_i32_0 = arith.constant 0 : i32
    return %c0_i32, %arg1 : i32, i32
  }
  func.func @transform_2(%arg0: i32, %arg1: i32) -> (i32, i32) {
    %c0_i32 = arith.constant 0 : i32
    %c0_i32_0 = arith.constant 0 : i32
    return %c0_i32, %arg1 : i32, i32
  }
  func.func @transform_3(%arg0: i32, %arg1: i32) -> (i32, i32) {
    %c0_i32 = arith.constant 0 : i32
    %c0_i32_0 = arith.constant 0 : i32
    return %c0_i32, %arg1 : i32, i32
  }
  func.func @transform_4(%arg0: i32, %arg1: i32) -> i32 {
    %c0_i32 = arith.constant 0 : i32
    %c0_i32_0 = arith.constant 0 : i32
    return %c0_i32 : i32
  }
  func.func @transform_5(%arg0: i32, %arg1: i32) -> (i32, i32) {
    %c0_i32 = arith.constant 0 : i32
    %c0_i32_0 = arith.constant 0 : i32
    return %arg0, %c0_i32 : i32, i32
  }
}

</mosaic_0001>

<bundles_post_ra>
// kernel: _critic_forward_impl.1
= control target key start
LH: loop header
LB: loop body
LE: loop exit
PB: predicated region body
PF: predicated region fallthrough
CT: control target
= control target key end

     0   :  { %11 = vsyncpa [#allocation5], 0  ;;  %s452_s0 = inlined_call_operand.hbm [shape: f32[8,256], index: 0, kind: input, shape index: {}]   ;;  %s453_s1 = inlined_call_operand.hbm [shape: bf16[256,128], index: 1, kind: input, shape index: {}]   ;;  %s454_s2 = inlined_call_operand.vmem [shape: f32[1,128], index: 2, kind: input, shape index: {}]   ;;  %s455_s3 = inlined_call_operand.vmem [shape: f32[1,128], index: 3, kind: input, shape index: {}]   ;;  %s456_s4 = inlined_call_operand.<no memory space> [shape: f32[1], index: 4, kind: input, shape index: {}]   ;;  %s457_s5 = inlined_call_operand.vmem [shape: f32[8,1], index: 5, kind: output, shape index: {}]  }
   0x1   :  { %12 = vsyncpa [#allocation7], 0  ;;  %s371_s18 = smov [#allocation4]   ;;  %s372_s20 = smov [#allocation6]  }
   0x2   :  { %s19_s19 = sshll.u32 %s371_s18, 4  ;;  %s28_s21 = sshll.u32 %s372_s20, 4  ;;  %s20_s19 = int_to_ptr.vmem [resolvable:$true] %s19_s19  ;;  %s406_s21 = int_to_ptr.vmem [resolvable:$true] %s28_s21 }
   0x3   :  { %s323_s24 = scalar_lea.hbm %s452_s0, 256 }
   0x4   :  { %p324_p0 = scmp.ne.s32.totalorder %s452_s0, %s323_s24  ;;  %p327_p1 = scmp.lt.u32.totalorder %s323_s24, %s452_s0 }
   0x6   :  { %p329_p2 = pnand %p327_p1, %p324_p0 }
   0x8   :  { %332 = shalt.err (!%p329_p2)
}
   0x9   :  { %s333_s29 = scalar_lea.vmem %s20_s19, 256  ;;  %p338_p4 = scmp.lt.s32.totalorder %s20_s19, %s20_s19 }
   0xa   :  { %p334_p3 = scmp.ne.s32.totalorder %s20_s19, %s333_s29  ;;  %p339_p5 = scmp.lt.s32.totalorder %s333_s29, %s333_s29 }
   0xc   :  { %p340_p6 = por %p339_p5, %p338_p4 }
   0xe   :  { %p341_p7 = pnand %p340_p6, %p334_p3 }
  0x10   :  { %344 = shalt.err (!%p341_p7)
}
  0x11   :  { %22 = dma.hbm_to_vmem [thread:$0]  %s452_s0, 256, %s20_s19, [#allocation5]  }
  0x12   :  { %s345_s9 = scalar_lea.hbm %s453_s1, 2048 }
  0x13   :  { %p346_p8 = scmp.ne.s32.totalorder %s453_s1, %s345_s9  ;;  %p349_p9 = scmp.lt.u32.totalorder %s345_s9, %s453_s1 }
  0x15   :  { %p351_p10 = pnand %p349_p9, %p346_p8 }
  0x17   :  { %354 = shalt.err (!%p351_p10)
}
  0x18   :  { %s355_s14 = scalar_lea.vmem %s406_s21, 2048  ;;  %p360_p12 = scmp.lt.s32.totalorder %s406_s21, %s406_s21 }
  0x19   :  { %p356_p11 = scmp.ne.s32.totalorder %s406_s21, %s355_s14  ;;  %p361_p13 = scmp.lt.s32.totalorder %s355_s14, %s355_s14 }
  0x1b   :  { %p362_p0 = por %p361_p13, %p360_p12 }
  0x1d   :  { %p363_p1 = pnand %p362_p0, %p356_p11 }
  0x1f   :  { %366 = shalt.err (!%p363_p1)
}
  0x20   :  { %s373_s0 = smov 64   ;;  %s374_s15 = smov 4  }
  0x21   :  { %34 = dma.hbm_to_vmem [thread:$0]  %s453_s1, 2048, %s406_s21, [#allocation7], %s373_s0, %s373_s0, %s374_s15  }
  0x22   :  { %367 = dma.done.wait [#allocation5], 256  }
  0x23   :  { %368 = vsyncadd [#allocation5], 4294967040 }
  0x24   :  { %369 = dma.done.wait [#allocation7], 2048  }
  0x25   :  { %370 = vsyncadd [#allocation7], 4294965248  ;;  %v307_v0 = vld [vmem:[#allocation6 + $0x40] sm:$0xff]   ;;  %v309_v2 = vld [vmem:[#allocation6 + $0x48] sm:$0xff]   ;;  %vm52_vm0 = vcmask 7168   ;;  %v375_v20 = vmov 0.0   ;;  %v253_v34 = vstv %s456_s4 }
  0x26   :  { %v308_v1 = vld [vmem:[#allocation6] sm:$0xff]   ;;  %280 = vmatprep.subr.bf16.mxu0 %v307_v0  ;;  %v310_v3 = vld [vmem:[#allocation6 + $0x8] sm:$0xff]   ;;  %v311_v4 = vld [vmem:[#allocation6 + $0x50] sm:$0xff]   ;;  %53 = vst.msk [vmem:[#allocation2] sm:$0xff] %vm52_vm0, %v375_v20 }
  0x27   :  { %281 = vmatpush3.bf16.msra.mxu0 %v308_v1  ;;  %v312_v5 = vld [vmem:[#allocation6 + $0x10] sm:$0xff]   ;;  %v313_v6 = vld [vmem:[#allocation6 + $0x58] sm:$0xff]   ;;  %v315_v8 = vld [vmem:[#allocation6 + $0x60] sm:$0xff]  }
  0x28   :  { %282 = vmatprep.subr.bf16.mxu0 %v309_v2  ;;  %v314_v7 = vld [vmem:[#allocation6 + $0x18] sm:$0xff]   ;;  %v316_v9 = vld [vmem:[#allocation6 + $0x20] sm:$0xff]   ;;  %v317_v10 = vld [vmem:[#allocation6 + $0x68] sm:$0xff]  }
  0x29   :  { %v55_v11 = vld [vmem:[#allocation4 + $0x8] sm:$0xff]  ;;  %v318_v13 = vld [vmem:[#allocation6 + $0x28] sm:$0xff]   ;;  %v319_v14 = vld [vmem:[#allocation6 + $0x70] sm:$0xff]  }
  0x2a   :  { %v57_v12 = vpack.c.bf16 %v55_v11, %v55_v11  ;;  %v320_v15 = vld [vmem:[#allocation6 + $0x30] sm:$0xff]   ;;  %v321_v16 = vld [vmem:[#allocation6 + $0x78] sm:$0xff]   ;;  %v262_v23 = vld [vmem:[%s454_s2] ss:$0 sm:$0xff] }
  0x2b   :  { %283 = vmatpush3.bf16.msra.mxu0 %v310_v3  ;;  %v322_v17 = vld [vmem:[#allocation6 + $0x38] sm:$0xff]   ;;  %v54_v18 = vld [vmem:[#allocation4] sm:$0xff]  ;;  %v279_v28 = vld [vmem:[%s455_s3] ss:$0 sm:$0xff] }
  0x2c   :  { %284 = vmatprep.subr.bf16.mxu0 %v311_v4  ;;  %225 = vmatprep.mubr.bf16.mxu0 %v57_v12  ;;  %v56_v19 = vpack.c.bf16 %v54_v18, %v54_v18 }
  0x2d   :  { %v234_v31 = vld [vmem:[#allocation2] sm:$0xff] }
  0x2f   :  { %285 = vmatpush3.bf16.msra.mxu0 %v312_v5 }
  0x30   :  { %286 = vmatprep.subr.bf16.mxu0 %v313_v6 }
  0x33   :  { %287 = vmatpush3.bf16.msra.mxu0 %v314_v7 }
  0x34   :  { %288 = vmatprep.subr.bf16.mxu0 %v315_v8 }
  0x37   :  { %289 = vmatpush3.bf16.msra.mxu0 %v316_v9 }
  0x38   :  { %290 = vmatprep.subr.bf16.mxu0 %v317_v10 }
  0x3b   :  { %291 = vmatpush3.bf16.msra.mxu0 %v318_v13 }
  0x3c   :  { %292 = vmatprep.subr.bf16.mxu0 %v319_v14 }
  0x3f   :  { %293 = vmatpush3.bf16.msra.mxu0 %v320_v15 }
  0x40   :  { %294 = vmatprep.subr.bf16.mxu0 %v321_v16 }
  0x43   :  { %295 = vmatpush3.bf16.msra.mxu0 %v322_v17 }
  0x46   :  { %226 = vmatmul.mubr.bf16.vlgmr.msra.gmra.mrb[0].mxu0 %v56_v19 }
 0x119   :  { %v296_v21 = vpop.f32.mrb[0].mxu0 }
 0x11a   :  { %v297_v22 = vpop.f32.mrb[1].mxu0 }
 0x11b   :  { %v298_v24 = vadd.f32 %v297_v22, %v296_v21  ;;  %v299_v25 = vpop.f32.mrb[2].mxu0 }
 0x11c   :  { %v300_v26 = vpop.f32.mrb[3].mxu0 }
 0x11d   :  { %v228_v27 = vadd.f32 %v298_v24, %v262_v23 }
 0x11f   :  { %v233_v29 = vmax.f32 %v228_v27, 0.0 }
 0x121   :  { %v242_v30 = vmul.f32 %v279_v28, %v233_v29 }
 0x123   :  { %243 = vadd.xlane.f32.xlu0 %v242_v30 }
 0x1b0   :  { %v244_v32 = vpop.xlane.xlu0 %243 }
 0x1b1   :  { %v245_v33 = vadd.f32 %v244_v32, %v234_v31 }
 0x1b3   :  { %247 = vst.msk [vmem:[#allocation2] sm:$0xff] %vm52_vm0, %v245_v33 }
 0x1ba   :  { %v251_v35 = vld [vmem:[#allocation2] sm:$0xff] }
 0x1bb   :  { %v254_v36 = vadd.f32 %v253_v34, %v251_v35 }
 0x1bd   :  { %255 = vst.msk [vmem:[%s457_s5] sm:$0xff] %vm52_vm0, %v254_v36 }
 0x1be   :  { %260 = vsyncpa [#allocation5], 1 }
 0x1bf   :  { %261 = vsyncpa [#allocation7], 1 }

</bundles_post_ra>
